<compile_context>
chip_gen: v7x
topology: tpu7x:2x2x1
jax: 0.10.0
libtpu: 0.0.40
codegen_flags: <defaults>
</compile_context>

<pallas_src>
import functools

import jax
import jax.numpy as jnp
from jax import lax
from jax.experimental import pallas as pl
from jax.experimental.pallas import tpu as pltpu


def _round_up(v, m):
    return (v + m - 1) // m * m


def _gamma_forward_kernel(a_ref, b_ref, xdT_ref, yd_ref, theta0_ref,
                          losses_ref, theta_out_ref, stack_ref,
                          *, n_steps, n_dev, t_pad):
    """Whole unrolled inner-training loop in one kernel invocation.

    a_ref      : VMEM (n_steps, Dp, Dp)  eta_t * X^T diag(gamma_t) X   (zero padded)
    b_ref      : VMEM (n_steps, 1, Dp)   eta_t * X^T (gamma_t * y)     (zero padded)
    xdT_ref    : VMEM (Dp, Mp)           dev inputs, pre-transposed    (zero padded)
    yd_ref     : VMEM (1, Mp)            dev labels                    (zero padded)
    theta0_ref : VMEM (1, Dp)            initial inner-model params    (zero padded)
    losses_ref : VMEM (Tp, 128)          dev loss per step (column 0; full-width store)
    theta_out  : VMEM (1, Dp)            final theta (written once)
    stack_ref  : VMEM (Tp, Dp) scratch   per-step thetas for batched dev eval
    """
    dims = (((1,), (0,)), ((), ()))          # canonical A @ B contraction

    stack_ref[...] = jnp.zeros_like(stack_ref)   # zero padded rows once

    theta = theta0_ref[...]                  # (1, Dp)
    stack_ref[pl.ds(0, 1), :] = theta

    # ---- unrolled inner SGD loop (n_steps is a small static int) ----
    # theta <- theta - (theta @ A_t - b_t) ; eta already folded into A_t / b_t.
    for t in range(n_steps):
        g = lax.dot_general(theta, a_ref[t], dims,
                            preferred_element_type=jnp.float32)   # (1, Dp)
        theta = theta - (g - b_ref[t])
        stack_ref[pl.ds(t + 1, 1), :] = theta                     # off critical path

    # ---- batched dev-loss evaluation: one matmul for all n_steps+1 thetas ----
    theta_stack = stack_ref[...]                                   # (Tp, Dp)
    pred = lax.dot_general(theta_stack, xdT_ref[...], dims,
                           preferred_element_type=jnp.float32)     # (Tp, Mp)
    r = pred - yd_ref[...]
    loss_col = (0.5 / n_dev) * jnp.sum(r * r, axis=-1, keepdims=True)   # (Tp, 1)

    losses_ref[...] = jnp.broadcast_to(loss_col, losses_ref.shape)  # single unmasked store
    theta_out_ref[...] = theta                                      # single store


@functools.partial(jax.jit, static_argnames=("warmup_iters", "n_steps"))
def gamma_model_forward(theta0, xn, yn, dev_xn, dev_yn, gamma_all, eta,
                        *, warmup_iters, n_steps):
    """theta0 (D,), xn (N, D), yn (N,), dev_xn (M, D), dev_yn (M,), gamma_all (n_steps, N)."""
    D = theta0.shape[0]
    M = dev_xn.shape[0]

    Dp = _round_up(D, 128)
    Mp = _round_up(M, 128)
    Tp = _round_up(n_steps + 1, 8)

    f32 = jnp.float32
    # constant_schedule_with_warmup, precomputed per inner step (guard warmup_iters=0).
    wm = max(int(warmup_iters), 1)
    ts = jnp.arange(n_steps, dtype=f32)
    etas = jnp.where(ts < warmup_iters, eta * ts / float(wm), eta).astype(f32)

    xn32 = xn.astype(f32)
    yn32 = yn.astype(f32)
    g32 = gamma_all.astype(f32)
    hp = lax.Precision.HIGHEST

    # Gram-matrix precompute (batched MXU matmul in XLA):
    #   A_t = eta_t * X^T diag(gamma_t) X ,  b_t = eta_t * X^T (gamma_t * y)
    A = jnp.einsum("tn,nd,ne->tde", g32, xn32, xn32, precision=hp) * etas[:, None, None]
    b = jnp.einsum("tn,n,nd->td", g32, yn32, xn32, precision=hp) * etas[:, None]

    A_pad = jnp.zeros((n_steps, Dp, Dp), f32).at[:, :D, :D].set(A)
    b_pad = jnp.zeros((n_steps, 1, Dp), f32).at[:, 0, :D].set(b)
    xdT = jnp.zeros((Dp, Mp), f32).at[:D, :M].set(dev_xn.astype(f32).T)
    yd2 = jnp.zeros((1, Mp), f32).at[0, :M].set(dev_yn.astype(f32))
    theta2 = jnp.zeros((1, Dp), f32).at[0, :D].set(theta0.astype(f32))

    kernel = functools.partial(_gamma_forward_kernel,
                               n_steps=n_steps, n_dev=M, t_pad=Tp)

    flops = 2 * n_steps * Dp * Dp + 2 * Tp * Dp * Mp
    bytes_accessed = 4 * (n_steps * Dp * Dp + n_steps * Dp + Dp * Mp + Mp + Dp
                          + Tp * 128 + Dp)
    ce = pl.CostEstimate(flops=int(flops), transcendentals=0,
                         bytes_accessed=int(bytes_accessed))

    losses_pad, theta_pad = pl.pallas_call(
        kernel,
        out_shape=(
            jax.ShapeDtypeStruct((Tp, 128), jnp.float32),   # dev losses, column 0
            jax.ShapeDtypeStruct((1, Dp), jnp.float32),     # final theta
        ),
        in_specs=[
            pl.BlockSpec(memory_space=pltpu.MemorySpace.VMEM),   # A_t table
            pl.BlockSpec(memory_space=pltpu.MemorySpace.VMEM),   # b_t table
            pl.BlockSpec(memory_space=pltpu.MemorySpace.VMEM),   # dev X^T
            pl.BlockSpec(memory_space=pltpu.MemorySpace.VMEM),   # dev y
            pl.BlockSpec(memory_space=pltpu.MemorySpace.VMEM),   # theta0
        ],
        out_specs=(
            pl.BlockSpec(memory_space=pltpu.MemorySpace.VMEM),
            pl.BlockSpec(memory_space=pltpu.MemorySpace.VMEM),
        ),
        scratch_shapes=[pltpu.VMEM((Tp, Dp), jnp.float32)],      # per-step theta stack
        cost_estimate=ce,
    )(A_pad, b_pad, xdT, yd2, theta2)

    all_losses = losses_pad[:n_steps + 1, 0]
    area_loss = jnp.sum(all_losses) / n_steps
    return area_loss, all_losses, theta_pad[0, :D]


def gamma_model_forward_ref(theta0, xn, yn, dev_xn, dev_yn, gamma_all, eta,
                            *, warmup_iters, n_steps):
    """Pure-JAX reference of the same forward semantics."""
    theta = theta0.astype(jnp.float32)
    losses = []
    for t in range(n_steps):
        eta_t = eta * t / warmup_iters if t < warmup_iters else eta
        rd = dev_xn @ theta - dev_yn
        losses.append(0.5 * jnp.mean(rd * rd))
        r = xn @ theta - yn
        g = xn.T @ (gamma_all[t] * r)
        theta = theta - eta_t * g
    rd = dev_xn @ theta - dev_yn
    losses.append(0.5 * jnp.mean(rd * rd))
    losses = jnp.stack(losses)
    return jnp.sum(losses) / n_steps, losses, theta


if __name__ == "__main__":
    # Small synthetic problem.
    D = 32        # inner-model parameter dim (theta)
    N = 64        # n_gamma = number of training samples (per-sample gamma weights)
    M = 32        # dev samples
    n_steps = 8
    n_wm_steps = 2      # only changes autograd (no_grad) behavior, not forward values
    warmup_iters = 2
    eta = 0.05

    key = jax.random.PRNGKey(0)
    k1, k2, k3, k4, k5 = jax.random.split(key, 5)
    w_true = jax.random.normal(k1, (D,), dtype=jnp.float32)
    xn = jax.random.normal(k2, (N, D), dtype=jnp.float32)
    yn = xn @ w_true + 0.01 * jax.random.normal(k3, (N,), dtype=jnp.float32)
    dev_xn = jax.random.normal(k4, (M, D), dtype=jnp.float32)
    dev_yn = dev_xn @ w_true + 0.01 * jax.random.normal(k5, (M,), dtype=jnp.float32)

    theta0 = jnp.zeros((D,), dtype=jnp.float32)
    # nn.ParameterList([torch.ones(n_gamma) / n_gamma for _ in range(n_steps)])
    gamma_all = jnp.full((n_steps, N), 1.0 / N, dtype=jnp.float32)

    area_loss, all_losses, theta_final = gamma_model_forward(
        theta0, xn, yn, dev_xn, dev_yn, gamma_all, eta,
        warmup_iters=warmup_iters, n_steps=n_steps)
    jax.block_until_ready((area_loss, all_losses, theta_final))

    # logging losses (every inner_log_interval=10 steps), host-side glue like the module
    all_logging_losses = [round(float(l), 4) for i, l in enumerate(all_losses[:-1]) if i % 10 == 0]

    # correctness check vs pure-JAX reference
    ref_area, ref_losses, ref_theta = gamma_model_forward_ref(
        theta0, xn, yn, dev_xn, dev_yn, gamma_all, eta,
        warmup_iters=warmup_iters, n_steps=n_steps)
    assert jnp.allclose(all_losses, ref_losses, rtol=1e-3, atol=1e-4), (all_losses, ref_losses)
    assert jnp.allclose(theta_final, ref_theta, rtol=1e-3, atol=1e-4)
    assert jnp.allclose(area_loss, ref_area, rtol=1e-3, atol=1e-4)
    del all_logging_losses

    print("KERNEL_OK")
</pallas_src>

<mosaic_0001>
module attributes {stable_mosaic.version = 11 : i64} {
  func.func @_gamma_forward_kernel(%arg0: memref<8x128x128xf32, #tpu.memory_space<vmem>>, %arg1: memref<8x1x128xf32, #tpu.memory_space<vmem>>, %arg2: memref<128x128xf32, #tpu.memory_space<vmem>>, %arg3: memref<1x128xf32, #tpu.memory_space<vmem>>, %arg4: memref<1x128xf32, #tpu.memory_space<vmem>>, %arg5: memref<16x128xf32, #tpu.memory_space<vmem>>, %arg6: memref<1x128xf32, #tpu.memory_space<vmem>>, %arg7: memref<16x128xf32, #tpu.memory_space<vmem>>) attributes {dimension_semantics = [], scalar_prefetch = 0 : i64, scratch_operands = 1 : i64, tpu.core_type = #tpu.core_type<tc>} {
    %cst = arith.constant 0.000000e+00 : f32
    %0 = vector.broadcast %cst : f32 to vector<16x128xf32>
    %c0 = arith.constant 0 : index
    %c0_0 = arith.constant 0 : index
    %1 = vector.load %arg7[%c0, %c0_0] : memref<16x128xf32, #tpu.memory_space<vmem>>, vector<16x128xf32>
    tpu.vector_store %arg7[%c0, %c0_0], %0 {strides = array<i32>} : memref<16x128xf32, #tpu.memory_space<vmem>>, vector<16x128xf32>,
    %c0_1 = arith.constant 0 : index
    %c0_2 = arith.constant 0 : index
    %2 = vector.load %arg4[%c0_1, %c0_2] : memref<1x128xf32, #tpu.memory_space<vmem>>, vector<1x128xf32>
    %c0_3 = arith.constant 0 : index
    %c0_4 = arith.constant 0 : index
    %3 = vector.load %arg7[%c0_3, %c0_4] : memref<16x128xf32, #tpu.memory_space<vmem>>, vector<1x128xf32>
    tpu.vector_store %arg7[%c0_3, %c0_4], %2 {strides = array<i32>} : memref<16x128xf32, #tpu.memory_space<vmem>>, vector<1x128xf32>,
    %c0_5 = arith.constant 0 : index
    %c0_6 = arith.constant 0 : index
    %c0_7 = arith.constant 0 : index
    %4 = vector.load %arg0[%c0_5, %c0_6, %c0_7] : memref<8x128x128xf32, #tpu.memory_space<vmem>>, vector<1x128x128xf32>
    %5 = vector.shape_cast %4 : vector<1x128x128xf32> to vector<128x128xf32>
    %cst_8 = arith.constant dense<0.000000e+00> : vector<1x128xf32>
    %6 = tpu.matmul %2, %5, %cst_8 {dimension_numbers = #tpu.dot_dimension_numbers<[1], [0], [0], [1], [0, 0, 1, 1], [], []>} : vector<1x128xf32>, vector<128x128xf32>, vector<1x128xf32> -> vector<1x128xf32>
    %c0_9 = arith.constant 0 : index
    %c0_10 = arith.constant 0 : index
    %c0_11 = arith.constant 0 : index
    %7 = vector.load %arg1[%c0_9, %c0_10, %c0_11] : memref<8x1x128xf32, #tpu.memory_space<vmem>>, vector<1x1x128xf32>
    %8 = vector.shape_cast %7 : vector<1x1x128xf32> to vector<1x128xf32>
    %9 = arith.subf %6, %8 : vector<1x128xf32>
    %10 = arith.subf %2, %9 : vector<1x128xf32>
    %c1 = arith.constant 1 : index
    %c0_12 = arith.constant 0 : index
    %11 = vector.load %arg7[%c1, %c0_12] : memref<16x128xf32, #tpu.memory_space<vmem>>, vector<1x128xf32>
    tpu.vector_store %arg7[%c1, %c0_12], %10 {strides = array<i32>} : memref<16x128xf32, #tpu.memory_space<vmem>>, vector<1x128xf32>,
    %c1_13 = arith.constant 1 : index
    %c0_14 = arith.constant 0 : index
    %c0_15 = arith.constant 0 : index
    %12 = vector.load %arg0[%c1_13, %c0_14, %c0_15] : memref<8x128x128xf32, #tpu.memory_space<vmem>>, vector<1x128x128xf32>
    %13 = vector.shape_cast %12 : vector<1x128x128xf32> to vector<128x128xf32>
    %cst_16 = arith.constant dense<0.000000e+00> : vector<1x128xf32>
    %14 = tpu.matmul %10, %13, %cst_16 {dimension_numbers = #tpu.dot_dimension_numbers<[1], [0], [0], [1], [0, 0, 1, 1], [], []>} : vector<1x128xf32>, vector<128x128xf32>, vector<1x128xf32> -> vector<1x128xf32>
    %c1_17 = arith.constant 1 : index
    %c0_18 = arith.constant 0 : index
    %c0_19 = arith.constant 0 : index
    %15 = vector.load %arg1[%c1_17, %c0_18, %c0_19] : memref<8x1x128xf32, #tpu.memory_space<vmem>>, vector<1x1x128xf32>
    %16 = vector.shape_cast %15 : vector<1x1x128xf32> to vector<1x128xf32>
    %17 = arith.subf %14, %16 : vector<1x128xf32>
    %18 = arith.subf %10, %17 : vector<1x128xf32>
    %c2 = arith.constant 2 : index
    %c0_20 = arith.constant 0 : index
    %19 = vector.load %arg7[%c2, %c0_20] : memref<16x128xf32, #tpu.memory_space<vmem>>, vector<1x128xf32>
    tpu.vector_store %arg7[%c2, %c0_20], %18 {strides = array<i32>} : memref<16x128xf32, #tpu.memory_space<vmem>>, vector<1x128xf32>,
    %c2_21 = arith.constant 2 : index
    %c0_22 = arith.constant 0 : index
    %c0_23 = arith.constant 0 : index
    %20 = vector.load %arg0[%c2_21, %c0_22, %c0_23] : memref<8x128x128xf32, #tpu.memory_space<vmem>>, vector<1x128x128xf32>
    %21 = vector.shape_cast %20 : vector<1x128x128xf32> to vector<128x128xf32>
    %cst_24 = arith.constant dense<0.000000e+00> : vector<1x128xf32>
    %22 = tpu.matmul %18, %21, %cst_24 {dimension_numbers = #tpu.dot_dimension_numbers<[1], [0], [0], [1], [0, 0, 1, 1], [], []>} : vector<1x128xf32>, vector<128x128xf32>, vector<1x128xf32> -> vector<1x128xf32>
    %c2_25 = arith.constant 2 : index
    %c0_26 = arith.constant 0 : index
    %c0_27 = arith.constant 0 : index
    %23 = vector.load %arg1[%c2_25, %c0_26, %c0_27] : memref<8x1x128xf32, #tpu.memory_space<vmem>>, vector<1x1x128xf32>
    %24 = vector.shape_cast %23 : vector<1x1x128xf32> to vector<1x128xf32>
    %25 = arith.subf %22, %24 : vector<1x128xf32>
    %26 = arith.subf %18, %25 : vector<1x128xf32>
    %c3 = arith.constant 3 : index
    %c0_28 = arith.constant 0 : index
    %27 = vector.load %arg7[%c3, %c0_28] : memref<16x128xf32, #tpu.memory_space<vmem>>, vector<1x128xf32>
    tpu.vector_store %arg7[%c3, %c0_28], %26 {strides = array<i32>} : memref<16x128xf32, #tpu.memory_space<vmem>>, vector<1x128xf32>,
    %c3_29 = arith.constant 3 : index
    %c0_30 = arith.constant 0 : index
    %c0_31 = arith.constant 0 : index
    %28 = vector.load %arg0[%c3_29, %c0_30, %c0_31] : memref<8x128x128xf32, #tpu.memory_space<vmem>>, vector<1x128x128xf32>
    %29 = vector.shape_cast %28 : vector<1x128x128xf32> to vector<128x128xf32>
    %cst_32 = arith.constant dense<0.000000e+00> : vector<1x128xf32>
    %30 = tpu.matmul %26, %29, %cst_32 {dimension_numbers = #tpu.dot_dimension_numbers<[1], [0], [0], [1], [0, 0, 1, 1], [], []>} : vector<1x128xf32>, vector<128x128xf32>, vector<1x128xf32> -> vector<1x128xf32>
    %c3_33 = arith.constant 3 : index
    %c0_34 = arith.constant 0 : index
    %c0_35 = arith.constant 0 : index
    %31 = vector.load %arg1[%c3_33, %c0_34, %c0_35] : memref<8x1x128xf32, #tpu.memory_space<vmem>>, vector<1x1x128xf32>
    %32 = vector.shape_cast %31 : vector<1x1x128xf32> to vector<1x128xf32>
    %33 = arith.subf %30, %32 : vector<1x128xf32>
    %34 = arith.subf %26, %33 : vector<1x128xf32>
    %c4 = arith.constant 4 : index
    %c0_36 = arith.constant 0 : index
    %35 = vector.load %arg7[%c4, %c0_36] : memref<16x128xf32, #tpu.memory_space<vmem>>, vector<1x128xf32>
    tpu.vector_store %arg7[%c4, %c0_36], %34 {strides = array<i32>} : memref<16x128xf32, #tpu.memory_space<vmem>>, vector<1x128xf32>,
    %c4_37 = arith.constant 4 : index
    %c0_38 = arith.constant 0 : index
    %c0_39 = arith.constant 0 : index
    %36 = vector.load %arg0[%c4_37, %c0_38, %c0_39] : memref<8x128x128xf32, #tpu.memory_space<vmem>>, vector<1x128x128xf32>
    %37 = vector.shape_cast %36 : vector<1x128x128xf32> to vector<128x128xf32>
    %cst_40 = arith.constant dense<0.000000e+00> : vector<1x128xf32>
    %38 = tpu.matmul %34, %37, %cst_40 {dimension_numbers = #tpu.dot_dimension_numbers<[1], [0], [0], [1], [0, 0, 1, 1], [], []>} : vector<1x128xf32>, vector<128x128xf32>, vector<1x128xf32> -> vector<1x128xf32>
    %c4_41 = arith.constant 4 : index
    %c0_42 = arith.constant 0 : index
    %c0_43 = arith.constant 0 : index
    %39 = vector.load %arg1[%c4_41, %c0_42, %c0_43] : memref<8x1x128xf32, #tpu.memory_space<vmem>>, vector<1x1x128xf32>
    %40 = vector.shape_cast %39 : vector<1x1x128xf32> to vector<1x128xf32>
    %41 = arith.subf %38, %40 : vector<1x128xf32>
    %42 = arith.subf %34, %41 : vector<1x128xf32>
    %c5 = arith.constant 5 : index
    %c0_44 = arith.constant 0 : index
    %43 = vector.load %arg7[%c5, %c0_44] : memref<16x128xf32, #tpu.memory_space<vmem>>, vector<1x128xf32>
    tpu.vector_store %arg7[%c5, %c0_44], %42 {strides = array<i32>} : memref<16x128xf32, #tpu.memory_space<vmem>>, vector<1x128xf32>,
    %c5_45 = arith.constant 5 : index
    %c0_46 = arith.constant 0 : index
    %c0_47 = arith.constant 0 : index
    %44 = vector.load %arg0[%c5_45, %c0_46, %c0_47] : memref<8x128x128xf32, #tpu.memory_space<vmem>>, vector<1x128x128xf32>
    %45 = vector.shape_cast %44 : vector<1x128x128xf32> to vector<128x128xf32>
    %cst_48 = arith.constant dense<0.000000e+00> : vector<1x128xf32>
    %46 = tpu.matmul %42, %45, %cst_48 {dimension_numbers = #tpu.dot_dimension_numbers<[1], [0], [0], [1], [0, 0, 1, 1], [], []>} : vector<1x128xf32>, vector<128x128xf32>, vector<1x128xf32> -> vector<1x128xf32>
    %c5_49 = arith.constant 5 : index
    %c0_50 = arith.constant 0 : index
    %c0_51 = arith.constant 0 : index
    %47 = vector.load %arg1[%c5_49, %c0_50, %c0_51] : memref<8x1x128xf32, #tpu.memory_space<vmem>>, vector<1x1x128xf32>
    %48 = vector.shape_cast %47 : vector<1x1x128xf32> to vector<1x128xf32>
    %49 = arith.subf %46, %48 : vector<1x128xf32>
    %50 = arith.subf %42, %49 : vector<1x128xf32>
    %c6 = arith.constant 6 : index
    %c0_52 = arith.constant 0 : index
    %51 = vector.load %arg7[%c6, %c0_52] : memref<16x128xf32, #tpu.memory_space<vmem>>, vector<1x128xf32>
    tpu.vector_store %arg7[%c6, %c0_52], %50 {strides = array<i32>} : memref<16x128xf32, #tpu.memory_space<vmem>>, vector<1x128xf32>,
    %c6_53 = arith.constant 6 : index
    %c0_54 = arith.constant 0 : index
    %c0_55 = arith.constant 0 : index
    %52 = vector.load %arg0[%c6_53, %c0_54, %c0_55] : memref<8x128x128xf32, #tpu.memory_space<vmem>>, vector<1x128x128xf32>
    %53 = vector.shape_cast %52 : vector<1x128x128xf32> to vector<128x128xf32>
    %cst_56 = arith.constant dense<0.000000e+00> : vector<1x128xf32>
    %54 = tpu.matmul %50, %53, %cst_56 {dimension_numbers = #tpu.dot_dimension_numbers<[1], [0], [0], [1], [0, 0, 1, 1], [], []>} : vector<1x128xf32>, vector<128x128xf32>, vector<1x128xf32> -> vector<1x128xf32>
    %c6_57 = arith.constant 6 : index
    %c0_58 = arith.constant 0 : index
    %c0_59 = arith.constant 0 : index
    %55 = vector.load %arg1[%c6_57, %c0_58, %c0_59] : memref<8x1x128xf32, #tpu.memory_space<vmem>>, vector<1x1x128xf32>
    %56 = vector.shape_cast %55 : vector<1x1x128xf32> to vector<1x128xf32>
    %57 = arith.subf %54, %56 : vector<1x128xf32>
    %58 = arith.subf %50, %57 : vector<1x128xf32>
    %c7 = arith.constant 7 : index
    %c0_60 = arith.constant 0 : index
    %59 = vector.load %arg7[%c7, %c0_60] : memref<16x128xf32, #tpu.memory_space<vmem>>, vector<1x128xf32>
    tpu.vector_store %arg7[%c7, %c0_60], %58 {strides = array<i32>} : memref<16x128xf32, #tpu.memory_space<vmem>>, vector<1x128xf32>,
    %c7_61 = arith.constant 7 : index
    %c0_62 = arith.constant 0 : index
    %c0_63 = arith.constant 0 : index
    %60 = vector.load %arg0[%c7_61, %c0_62, %c0_63] : memref<8x128x128xf32, #tpu.memory_space<vmem>>, vector<1x128x128xf32>
    %61 = vector.shape_cast %60 : vector<1x128x128xf32> to vector<128x128xf32>
    %cst_64 = arith.constant dense<0.000000e+00> : vector<1x128xf32>
    %62 = tpu.matmul %58, %61, %cst_64 {dimension_numbers = #tpu.dot_dimension_numbers<[1], [0], [0], [1], [0, 0, 1, 1], [], []>} : vector<1x128xf32>, vector<128x128xf32>, vector<1x128xf32> -> vector<1x128xf32>
    %c7_65 = arith.constant 7 : index
    %c0_66 = arith.constant 0 : index
    %c0_67 = arith.constant 0 : index
    %63 = vector.load %arg1[%c7_65, %c0_66, %c0_67] : memref<8x1x128xf32, #tpu.memory_space<vmem>>, vector<1x1x128xf32>
    %64 = vector.shape_cast %63 : vector<1x1x128xf32> to vector<1x128xf32>
    %65 = arith.subf %62, %64 : vector<1x128xf32>
    %66 = arith.subf %58, %65 : vector<1x128xf32>
    %c8 = arith.constant 8 : index
    %c0_68 = arith.constant 0 : index
    %67 = vector.load %arg7[%c8, %c0_68] : memref<16x128xf32, #tpu.memory_space<vmem>>, vector<1x128xf32>
    tpu.vector_store %arg7[%c8, %c0_68], %66 {strides = array<i32>} : memref<16x128xf32, #tpu.memory_space<vmem>>, vector<1x128xf32>,
    %c0_69 = arith.constant 0 : index
    %c0_70 = arith.constant 0 : index
    %68 = vector.load %arg7[%c0_69, %c0_70] : memref<16x128xf32, #tpu.memory_space<vmem>>, vector<16x128xf32>
    %c0_71 = arith.constant 0 : index
    %c0_72 = arith.constant 0 : index
    %69 = vector.load %arg2[%c0_71, %c0_72] : memref<128x128xf32, #tpu.memory_space<vmem>>, vector<128x128xf32>
    %cst_73 = arith.constant dense<0.000000e+00> : vector<16x128xf32>
    %70 = tpu.matmul %68, %69, %cst_73 {dimension_numbers = #tpu.dot_dimension_numbers<[1], [0], [0], [1], [0, 0, 1, 1], [], []>} : vector<16x128xf32>, vector<128x128xf32>, vector<16x128xf32> -> vector<16x128xf32>
    %c0_74 = arith.constant 0 : index
    %c0_75 = arith.constant 0 : index
    %71 = vector.load %arg3[%c0_74, %c0_75] : memref<1x128xf32, #tpu.memory_space<vmem>>, vector<1x128xf32>
    %72 = vector.broadcast %71 : vector<1x128xf32> to vector<16x128xf32>
    %73 = arith.subf %70, %72 : vector<16x128xf32>
    %74 = arith.mulf %73, %73 : vector<16x128xf32>
    %cst_76 = arith.constant dense<0.000000e+00> : vector<16xf32>
    %75 = vector.multi_reduction <add>, %74, %cst_76 [1] : vector<16x128xf32> to vector<16xf32>
    %76 = vector.shape_cast %75 : vector<16xf32> to vector<16x1xf32>
    %cst_77 = arith.constant 1.562500e-02 : f32
    %77 = vector.broadcast %cst_77 : f32 to vector<16x1xf32>
    %78 = arith.mulf %77, %76 : vector<16x1xf32>
    %79 = vector.shape_cast %78 : vector<16x1xf32> to vector<16x1xf32>
    %80 = vector.broadcast %79 : vector<16x1xf32> to vector<16x128xf32>
    %c0_78 = arith.constant 0 : index
    %c0_79 = arith.constant 0 : index
    %81 = vector.load %arg5[%c0_78, %c0_79] : memref<16x128xf32, #tpu.memory_space<vmem>>, vector<16x128xf32>
    tpu.vector_store %arg5[%c0_78, %c0_79], %80 {strides = array<i32>} : memref<16x128xf32, #tpu.memory_space<vmem>>, vector<16x128xf32>,
    %c0_80 = arith.constant 0 : index
    %c0_81 = arith.constant 0 : index
    %82 = vector.load %arg6[%c0_80, %c0_81] : memref<1x128xf32, #tpu.memory_space<vmem>>, vector<1x128xf32>
    tpu.vector_store %arg6[%c0_80, %c0_81], %66 {strides = array<i32>} : memref<1x128xf32, #tpu.memory_space<vmem>>, vector<1x128xf32>,
    return
  }
}

</mosaic_0001>

<bundles_post_ra>
// kernel: gamma_model_forward.1
= control target key start
LH: loop header
LB: loop body
LE: loop exit
PB: predicated region body
PF: predicated region fallthrough
CT: control target
= control target key end

     0   :  { %v1697_v0 = vmov 0.0|0.0   ;;  %vm1698_vm0 = vmmov 0   ;;  %v1699_v4 = vmov 0.0   ;;  %s2293_s0 = inlined_call_operand.vmem [shape: f32[8,128,128], index: 0, kind: input, shape index: {}]   ;;  %s2294_s4 = inlined_call_operand.vmem [shape: f32[1,128], index: 4, kind: input, shape index: {}]   ;;  %s2295_s1 = inlined_call_operand.vmem [shape: f32[8,1,128], index: 1, kind: input, shape index: {}]   ;;  %s2296_s2 = inlined_call_operand.vmem [shape: f32[128,128], index: 2, kind: input, shape index: {}]   ;;  %s2297_s6 = inlined_call_operand.vmem [shape: f32[1,128], index: 6, kind: output, shape index: {1}]   ;;  %s2298_s3 = inlined_call_operand.vmem [shape: f32[1,128], index: 3, kind: input, shape index: {}]   ;;  %s2299_s5 = inlined_call_operand.vmem [shape: f32[16,128], index: 5, kind: output, shape index: {0}]  }
   0x1   :  { %1470 = vmatprep.subr.bf16.mxu0 %v1697_v0  ;;  %v26_v1 = vld [vmem:[%s2293_s0] sm:$0xff]  ;;  %v27_v2 = vld [vmem:[%s2293_s0 + $0x8] sm:$0xff]  ;;  %v28_v3 = vld [vmem:[%s2293_s0 + $0x10] sm:$0xff]  ;;  %1187 = vmatprep.mubr.msk.f32.mxu0 %vm1698_vm0, %v1699_v4  ;;  %22 = vst [vmem:[#allocation2] sm:$0xff] %v1699_v4 }
   0x2   :  { %23 = vst [vmem:[#allocation2 + $0x8] sm:$0xff] %v1699_v4  ;;  %v1471_v5 = vpack.c.bf16 %v27_v2, %v26_v1  ;;  %v29_v6 = vld [vmem:[%s2293_s0 + $0x18] sm:$0xff]  ;;  %1494 = vmatprep.subr.bf16.mxu1 %v1697_v0  ;;  %1222 = vmatprep.mubr.msk.f32.mxu1 %vm1698_vm0, %v1699_v4  ;;  %v30_v8 = vld [vmem:[%s2293_s0 + $0x20] sm:$0xff]  ;;  %v31_v9 = vld [vmem:[%s2293_s0 + $0x28] sm:$0xff] }
   0x3   :  { %v1474_v7 = vpack.c.bf16 %v29_v6, %v28_v3  ;;  %v1765_v10 = vld [vmem:[%s2294_s4] sm:$0x1]  ;;  %v882_v12 = vld [vmem:[%s2293_s0 + $0x88] sm:$0xff]  ;;  %v883_v13 = vld [vmem:[%s2293_s0 + $0x90] sm:$0xff]  ;;  %v1477_v15 = vpack.c.bf16 %v31_v9, %v30_v8 }
   0x4   :  { %1472 = vmatpush3.bf16.msra.mxu0 %v1471_v5  ;;  %v881_v11 = vld [vmem:[%s2293_s0 + $0x80] sm:$0xff]  ;;  %25 = vst [vmem:[#allocation2] sm:$0x1] %v1765_v10  ;;  %v884_v14 = vld [vmem:[%s2293_s0 + $0x98] sm:$0xff]  ;;  %v32_v17 = vld [vmem:[%s2293_s0 + $0x30] sm:$0xff] }
   0x5   :  { %1473 = vmatprep.subr.bf16.mxu0 %v1697_v0  ;;  %v1495_v16 = vpack.c.bf16 %v882_v12, %v881_v11  ;;  %v33_v18 = vld [vmem:[%s2293_s0 + $0x38] sm:$0xff]  ;;  %v1498_v19 = vpack.c.bf16 %v884_v14, %v883_v13  ;;  %v885_v20 = vld [vmem:[%s2293_s0 + $0xa0] sm:$0xff]  ;;  %v886_v21 = vld [vmem:[%s2293_s0 + $0xa8] sm:$0xff] }
   0x6   :  { %v1480_v22 = vpack.c.bf16 %v33_v18, %v32_v17  ;;  %v34_v23 = vld [vmem:[%s2293_s0 + $0x40] sm:$0xff]  ;;  %v35_v24 = vld [vmem:[%s2293_s0 + $0x48] sm:$0xff]  ;;  %v1501_v25 = vpack.c.bf16 %v886_v21, %v885_v20  ;;  %v887_v26 = vld [vmem:[%s2293_s0 + $0xb0] sm:$0xff] }
   0x7   :  { %1496 = vmatpush3.bf16.msra.mxu1 %v1495_v16  ;;  %v888_v27 = vld [vmem:[%s2293_s0 + $0xb8] sm:$0xff]  ;;  %v1483_v28 = vpack.c.bf16 %v35_v24, %v34_v23  ;;  %v36_v29 = vld [vmem:[%s2293_s0 + $0x50] sm:$0xff]  ;;  %v889_v32 = vld [vmem:[%s2293_s0 + $0xc0] sm:$0xff] }
   0x8   :  { %1475 = vmatpush3.bf16.msra.mxu0 %v1474_v7  ;;  %1497 = vmatprep.subr.bf16.mxu1 %v1697_v0  ;;  %v37_v30 = vld [vmem:[%s2293_s0 + $0x58] sm:$0xff]  ;;  %v1504_v31 = vpack.c.bf16 %v888_v27, %v887_v26  ;;  %v890_v33 = vld [vmem:[%s2293_s0 + $0xc8] sm:$0xff]  ;;  %v38_v35 = vld [vmem:[%s2293_s0 + $0x60] sm:$0xff] }
   0x9   :  { %1476 = vmatprep.subr.bf16.mxu0 %v1697_v0  ;;  %v1486_v34 = vpack.c.bf16 %v37_v30, %v36_v29  ;;  %v39_v36 = vld [vmem:[%s2293_s0 + $0x68] sm:$0xff]  ;;  %v1507_v37 = vpack.c.bf16 %v890_v33, %v889_v32  ;;  %v891_v38 = vld [vmem:[%s2293_s0 + $0xd0] sm:$0xff]  ;;  %v892_v39 = vld [vmem:[%s2293_s0 + $0xd8] sm:$0xff] }
   0xa   :  { %v1489_v40 = vpack.c.bf16 %v39_v36, %v38_v35  ;;  %v40_v41 = vld [vmem:[%s2293_s0 + $0x70] sm:$0xff]  ;;  %v41_v42 = vld [vmem:[%s2293_s0 + $0x78] sm:$0xff]  ;;  %v1510_v43 = vpack.c.bf16 %v892_v39, %v891_v38  ;;  %v893_v44 = vld [vmem:[%s2293_s0 + $0xe0] sm:$0xff] }
   0xb   :  { %1499 = vmatpush3.bf16.msra.mxu1 %v1498_v19  ;;  %v894_v45 = vld [vmem:[%s2293_s0 + $0xe8] sm:$0xff]  ;;  %v1492_v46 = vpack.c.bf16 %v41_v42, %v40_v41  ;;  %v895_v48 = vld [vmem:[%s2293_s0 + $0xf0] sm:$0xff]  ;;  %v896_v49 = vld [vmem:[%s2293_s0 + $0xf8] sm:$0xff] }
   0xc   :  { %1478 = vmatpush3.bf16.msra.mxu0 %v1477_v15  ;;  %1500 = vmatprep.subr.bf16.mxu1 %v1697_v0  ;;  %v1513_v47 = vpack.c.bf16 %v894_v45, %v893_v44  ;;  %v1516_v50 = vpack.c.bf16 %v896_v49, %v895_v48  ;;  %v898_v51 = vld [vmem:[%s2293_s0 + $0x100] sm:$0xff]  ;;  %v899_v52 = vld [vmem:[%s2293_s0 + $0x108] sm:$0xff]  ;;  %v900_v53 = vld [vmem:[%s2293_s0 + $0x110] sm:$0xff] }
   0xd   :  { %1479 = vmatprep.subr.bf16.mxu0 %v1697_v0  ;;  %v1519_v54 = vpack.c.bf16 %v899_v52, %v898_v51  ;;  %v901_v55 = vld [vmem:[%s2293_s0 + $0x118] sm:$0xff]  ;;  %v902_v57 = vld [vmem:[%s2293_s0 + $0x120] sm:$0xff]  ;;  %v903_v58 = vld [vmem:[%s2293_s0 + $0x128] sm:$0xff] }
   0xe   :  { %v1522_v56 = vpack.c.bf16 %v901_v55, %v900_v53  ;;  %v1525_v59 = vpack.c.bf16 %v903_v58, %v902_v57  ;;  %v904_v60 = vld [vmem:[%s2293_s0 + $0x130] sm:$0xff]  ;;  %v905_v61 = vld [vmem:[%s2293_s0 + $0x138] sm:$0xff]  ;;  %v906_v63 = vld [vmem:[%s2293_s0 + $0x140] sm:$0xff] }
   0xf   :  { %1502 = vmatpush3.bf16.msra.mxu1 %v1501_v25  ;;  %v1528_v62 = vpack.c.bf16 %v905_v61, %v904_v60  ;;  %v907_v1 = vld [vmem:[%s2293_s0 + $0x148] sm:$0xff]  ;;  %v908_v3 = vld [vmem:[%s2293_s0 + $0x150] sm:$0xff]  ;;  %v909_v5 = vld [vmem:[%s2293_s0 + $0x158] sm:$0xff] }
  0x10   :  { %1481 = vmatpush3.bf16.msra.mxu0 %v1480_v22  ;;  %1503 = vmatprep.subr.bf16.mxu1 %v1697_v0  ;;  %v1531_v2 = vpack.c.bf16 %v907_v1, %v906_v63  ;;  %v1534_v6 = vpack.c.bf16 %v909_v5, %v908_v3  ;;  %v910_v7 = vld [vmem:[%s2293_s0 + $0x160] sm:$0xff]  ;;  %v911_v8 = vld [vmem:[%s2293_s0 + $0x168] sm:$0xff]  ;;  %v912_v16 = vld [vmem:[%s2293_s0 + $0x170] sm:$0xff] }
  0x11   :  { %1482 = vmatprep.subr.bf16.mxu0 %v1697_v0  ;;  %v1537_v9 = vpack.c.bf16 %v911_v8, %v910_v7  ;;  %v112_v11 = vld [vmem:[%s2295_s1] sm:$0x1]  ;;  %v913_v17 = vld [vmem:[%s2293_s0 + $0x178] sm:$0xff]  ;;  %v916_v19 = vld [vmem:[%s2293_s0 + $0x188] sm:$0xff] }
  0x12   :  { %v1540_v18 = vpack.c.bf16 %v913_v17, %v912_v16  ;;  %v917_v20 = vld [vmem:[%s2293_s0 + $0x190] sm:$0xff]  ;;  %v918_v22 = vld [vmem:[%s2293_s0 + $0x198] sm:$0xff]  ;;  %v919_v24 = vld [vmem:[%s2293_s0 + $0x1a0] sm:$0xff] }
  0x13   :  { %1505 = vmatpush3.bf16.msra.mxu1 %v1504_v31  ;;  %v1546_v23 = vpack.c.bf16 %v918_v22, %v917_v20  ;;  %v920_v25 = vld [vmem:[%s2293_s0 + $0x1a8] sm:$0xff]  ;;  %v921_v27 = vld [vmem:[%s2293_s0 + $0x1b0] sm:$0xff]  ;;  %v923_v30 = vld [vmem:[%s2293_s0 + $0x1c0] sm:$0xff] }
  0x14   :  { %1484 = vmatpush3.bf16.msra.mxu0 %v1483_v28  ;;  %1506 = vmatprep.subr.bf16.mxu1 %v1697_v0  ;;  %v1549_v26 = vpack.c.bf16 %v920_v25, %v919_v24  ;;  %v922_v28 = vld [vmem:[%s2293_s0 + $0x1b8] sm:$0xff]  ;;  %v924_v31 = vld [vmem:[%s2293_s0 + $0x1c8] sm:$0xff]  ;;  %v925_v33 = vld [vmem:[%s2293_s0 + $0x1d0] sm:$0xff] }
  0x15   :  { %1485 = vmatprep.subr.bf16.mxu0 %v1697_v0  ;;  %v1552_v29 = vpack.c.bf16 %v922_v28, %v921_v27  ;;  %v1555_v32 = vpack.c.bf16 %v924_v31, %v923_v30  ;;  %v927_v36 = vld [vmem:[%s2293_s0 + $0x1e0] sm:$0xff]  ;;  %v929_v44 = vld [vmem:[%s2293_s0 + $0x1f0] sm:$0xff]  ;;  %v930_v45 = vld [vmem:[%s2293_s0 + $0x1f8] sm:$0xff] }
  0x16   :  { %v897_v39 = vld [vmem:[%s2295_s1 + $0x1] sm:$0x1]  ;;  %v933_v48 = vld [vmem:[%s2293_s0 + $0x208] sm:$0xff]  ;;  %v934_v49 = vld [vmem:[%s2293_s0 + $0x210] sm:$0xff] }
  0x17   :  { %1508 = vmatpush3.bf16.msra.mxu1 %v1507_v37  ;;  %v928_v37 = vld [vmem:[%s2293_s0 + $0x1e8] sm:$0xff]  ;;  %v935_v51 = vld [vmem:[%s2293_s0 + $0x218] sm:$0xff]  ;;  %v936_v53 = vld [vmem:[%s2293_s0 + $0x220] sm:$0xff] }
  0x18   :  { %1487 = vmatpush3.bf16.msra.mxu0 %v1486_v34  ;;  %1509 = vmatprep.subr.bf16.mxu1 %v1697_v0  ;;  %v926_v34 = vld [vmem:[%s2293_s0 + $0x1d8] sm:$0xff]  ;;  %v1561_v38 = vpack.c.bf16 %v928_v37, %v927_v36  ;;  %v1570_v52 = vpack.c.bf16 %v935_v51, %v934_v49  ;;  %v941_v60 = vld [vmem:[%s2293_s0 + $0x248] sm:$0xff]  ;;  %v951_v17 = vld [vmem:[%s2293_s0 + $0x290] sm:$0xff] }
  0x19   :  { %1488 = vmatprep.subr.bf16.mxu0 %v1697_v0  ;;  %v1558_v35 = vpack.c.bf16 %v926_v34, %v925_v33  ;;  %v939_v57 = vld [vmem:[%s2293_s0 + $0x238] sm:$0xff]  ;;  %v945_v3 = vld [vmem:[%s2293_s0 + $0x268] sm:$0xff]  ;;  %v953_v20 = vld [vmem:[%s2293_s0 + $0x2a0] sm:$0xff] }
  0x1a   :  { %v943_v63 = vld [vmem:[%s2293_s0 + $0x258] sm:$0xff]  ;;  %v950_v16 = vld [vmem:[%s2293_s0 + $0x288] sm:$0xff]  ;;  %v970_v49 = vld [vmem:[%s2293_s0 + $0x320] sm:$0xff] }
  0x1b   :  { %1511 = vmatpush3.bf16.msra.mxu1 %v1510_v43  ;;  %v956_v24 = vld [vmem:[%s2293_s0 + $0x2b8] sm:$0xff]  ;;  %v958_v27 = vld [vmem:[%s2293_s0 + $0x2c8] sm:$0xff] }
  0x1c   :  { %1490 = vmatpush3.bf16.msra.mxu0 %v1489_v40  ;;  %1512 = vmatprep.subr.bf16.mxu1 %v1697_v0  ;;  %v960_v30 = vld [vmem:[%s2293_s0 + $0x2d8] sm:$0xff]  ;;  %v962_v33 = vld [vmem:[%s2293_s0 + $0x2e8] sm:$0xff] }
  0x1d   :  { %1491 = vmatprep.subr.bf16.mxu0 %v1697_v0 }
  0x1f   :  { %1514 = vmatpush3.bf16.msra.mxu1 %v1513_v47  ;;  %v932_v47 = vld [vmem:[%s2293_s0 + $0x200] sm:$0xff] }
  0x20   :  { %1493 = vmatpush3.bf16.msra.mxu0 %v1492_v46  ;;  %1515 = vmatprep.subr.bf16.mxu1 %v1697_v0  ;;  %v1564_v46 = vpack.c.bf16 %v930_v45, %v929_v44  ;;  %v967_v44 = vld [vmem:[%s2293_s0 + $0x308] sm:$0xff]  ;;  %v968_v45 = vld [vmem:[%s2293_s0 + $0x310] sm:$0xff] }
  0x21   :  { %1518 = vmatprep.subr.bf16.mxu0 %v1697_v0 }
  0x23   :  { %1188 = vmatmul.mubr.f32.vlgmr.msra.gmra.mrb[0].mxu0 %v1765_v10  ;;  %1517 = vmatpush3.bf16.msra.mxu1 %v1516_v50  ;;  %v1567_v50 = vpack.c.bf16 %v933_v48, %v932_v47  ;;  %v969_v47 = vld [vmem:[%s2293_s0 + $0x318] sm:$0xff] }
  0x24   :  { %1257 = vmatprep.mubr.msk.f32.mxu0 %vm1698_vm0, %v1699_v4  ;;  %1542 = vmatprep.subr.bf16.mxu1 %v1697_v0  ;;  %v1618_v48 = vpack.c.bf16 %v969_v47, %v968_v45  ;;  %v769_v47 = vld [vmem:[%s2296_s2 + $0x38] sm:$0xff] }
  0x25   :  { %1520 = vmatpush3.bf16.msra.mxu0 %v1519_v54  ;;  %v937_v54 = vld [vmem:[%s2293_s0 + $0x228] sm:$0xff] }
  0x26   :  { %1521 = vmatprep.subr.bf16.mxu0 %v1697_v0  ;;  %v1573_v55 = vpack.c.bf16 %v937_v54, %v936_v53  ;;  %v973_v53 = vld [vmem:[%s2293_s0 + $0x338] sm:$0xff] }
  0x29   :  { %1523 = vmatpush3.bf16.msra.mxu0 %v1522_v56  ;;  %v938_v56 = vld [vmem:[%s2293_s0 + $0x230] sm:$0xff] }
  0x2a   :  { %1524 = vmatprep.subr.bf16.mxu0 %v1697_v0  ;;  %v1576_v58 = vpack.c.bf16 %v939_v57, %v938_v56  ;;  %v975_v56 = vld [vmem:[%s2293_s0 + $0x348] sm:$0xff] }
  0x2d   :  { %1526 = vmatpush3.bf16.msra.mxu0 %v1525_v59  ;;  %v940_v59 = vld [vmem:[%s2293_s0 + $0x240] sm:$0xff] }
  0x2e   :  { %1527 = vmatprep.subr.bf16.mxu0 %v1697_v0  ;;  %v1579_v61 = vpack.c.bf16 %v941_v60, %v940_v59  ;;  %v977_v59 = vld [vmem:[%s2293_s0 + $0x358] sm:$0xff] }
  0x31   :  { %1529 = vmatpush3.bf16.msra.mxu0 %v1528_v62  ;;  %v942_v62 = vld [vmem:[%s2293_s0 + $0x250] sm:$0xff] }
  0x32   :  { %1530 = vmatprep.subr.bf16.mxu0 %v1697_v0  ;;  %v1582_v1 = vpack.c.bf16 %v943_v63, %v942_v62  ;;  %v979_v62 = vld [vmem:[%s2293_s0 + $0x368] sm:$0xff] }
  0x35   :  { %1532 = vmatpush3.bf16.msra.mxu0 %v1531_v2  ;;  %v944_v2 = vld [vmem:[%s2293_s0 + $0x260] sm:$0xff] }
  0x36   :  { %1533 = vmatprep.subr.bf16.mxu0 %v1697_v0  ;;  %v1585_v5 = vpack.c.bf16 %v945_v3, %v944_v2 }
  0x39   :  { %1535 = vmatpush3.bf16.msra.mxu0 %v1534_v6  ;;  %v914_v6 = vld [vmem:[%s2295_s1 + $0x2] sm:$0x1] }
  0x3a   :  { %1536 = vmatprep.subr.bf16.mxu0 %v1697_v0 }
  0x3d   :  { %1538 = vmatpush3.bf16.msra.mxu0 %v1537_v9 }
  0x3e   :  { %1539 = vmatprep.subr.bf16.mxu0 %v1697_v0 }
  0x41   :  { %1541 = vmatpush3.bf16.msra.mxu0 %v1540_v18 }
  0x42   :  { %1566 = vmatprep.subr.bf16.mxu0 %v1697_v0 }
  0xf6   :  { %v108_v12 = vpop.f32.mrb[0].mxu0 }
  0xf7   :  { %v113_v13 = vsub.f32 %v108_v12, %v112_v11  ;;  %v1189_v14 = vpop.f32.mrb[1].mxu0  ;;  %v946_v12 = vld [vmem:[%s2293_s0 + $0x270] sm:$0xff] }
  0xf9   :  { %v114_v15 = vsub.f32 %v1765_v10, %v113_v13  ;;  %v915_v10 = vld [vmem:[%s2293_s0 + $0x180] sm:$0xff]  ;;  %v947_v13 = vld [vmem:[%s2293_s0 + $0x278] sm:$0xff] }
  0xfa   :  { %v1543_v21 = vpack.c.bf16 %v916_v19, %v915_v10  ;;  %v1588_v14 = vpack.c.bf16 %v947_v13, %v946_v12  ;;  %v952_v10 = vld [vmem:[%s2293_s0 + $0x298] sm:$0xff]  ;;  %v984_v12 = vld [vmem:[%s2293_s0 + $0x388] sm:$0xff] }
  0xfb   :  { %115 = vst [vmem:[#allocation2 + $0x1] sm:$0x1] %v114_v15  ;;  %1223 = vmatmul.mubr.f32.vlgmr.msra.gmra.mrb[0].mxu1 %v114_v15  ;;  %v1594_v19 = vpack.c.bf16 %v952_v10, %v951_v17  ;;  %v988_v17 = vld [vmem:[%s2293_s0 + $0x3a8] sm:$0xff]  ;;  %v989_v10 = vld [vmem:[%s2293_s0 + $0x3b0] sm:$0xff] }
  0xfc   :  { %1292 = vmatprep.mubr.msk.f32.mxu1 %vm1698_vm0, %v1699_v4  ;;  %1544 = vmatpush3.bf16.msra.mxu1 %v1543_v21  ;;  %v954_v21 = vld [vmem:[%s2293_s0 + $0x2a8] sm:$0xff] }
  0xfd   :  { %1545 = vmatprep.subr.bf16.mxu1 %v1697_v0  ;;  %v1597_v22 = vpack.c.bf16 %v954_v21, %v953_v20  ;;  %v991_v21 = vld [vmem:[%s2293_s0 + $0x3c0] sm:$0xff] }
 0x100   :  { %1547 = vmatpush3.bf16.msra.mxu1 %v1546_v23  ;;  %v955_v23 = vld [vmem:[%s2293_s0 + $0x2b0] sm:$0xff] }
 0x101   :  { %1548 = vmatprep.subr.bf16.mxu1 %v1697_v0  ;;  %v1600_v25 = vpack.c.bf16 %v956_v24, %v955_v23  ;;  %v993_v24 = vld [vmem:[%s2293_s0 + $0x3d0] sm:$0xff] }
 0x104   :  { %1550 = vmatpush3.bf16.msra.mxu1 %v1549_v26  ;;  %v957_v26 = vld [vmem:[%s2293_s0 + $0x2c0] sm:$0xff] }
 0x105   :  { %1551 = vmatprep.subr.bf16.mxu1 %v1697_v0  ;;  %v1603_v28 = vpack.c.bf16 %v958_v27, %v957_v26  ;;  %v995_v27 = vld [vmem:[%s2293_s0 + $0x3e0] sm:$0xff] }
 0x108   :  { %1553 = vmatpush3.bf16.msra.mxu1 %v1552_v29  ;;  %v959_v29 = vld [vmem:[%s2293_s0 + $0x2d0] sm:$0xff] }
 0x109   :  { %1554 = vmatprep.subr.bf16.mxu1 %v1697_v0  ;;  %v1606_v31 = vpack.c.bf16 %v960_v30, %v959_v29  ;;  %v965_v30 = vld [vmem:[%s2295_s1 + $0x5] sm:$0x1] }
 0x10c   :  { %1556 = vmatpush3.bf16.msra.mxu1 %v1555_v32  ;;  %v961_v32 = vld [vmem:[%s2293_s0 + $0x2e0] sm:$0xff] }
 0x10d   :  { %1557 = vmatprep.subr.bf16.mxu1 %v1697_v0  ;;  %v1609_v34 = vpack.c.bf16 %v962_v33, %v961_v32 }
 0x110   :  { %1559 = vmatpush3.bf16.msra.mxu1 %v1558_v35  ;;  %v931_v35 = vld [vmem:[%s2295_s1 + $0x3] sm:$0x1] }
 0x111   :  { %1560 = vmatprep.subr.bf16.mxu1 %v1697_v0 }
 0x114   :  { %1562 = vmatpush3.bf16.msra.mxu1 %v1561_v38 }
 0x115   :  { %1563 = vmatprep.subr.bf16.mxu1 %v1697_v0 }
 0x118   :  { %1565 = vmatpush3.bf16.msra.mxu1 %v1564_v46 }
 0x119   :  { %1590 = vmatprep.subr.bf16.mxu1 %v1697_v0 }
 0x1ce   :  { %v199_v40 = vpop.f32.mrb[0].mxu1 }
 0x1cf   :  { %v205_v41 = vsub.f32 %v199_v40, %v897_v39  ;;  %v1224_v42 = vpop.f32.mrb[1].mxu1  ;;  %v963_v40 = vld [vmem:[%s2293_s0 + $0x2f0] sm:$0xff] }
 0x1d1   :  { %v206_v43 = vsub.f32 %v114_v15, %v205_v41  ;;  %v949_v15 = vld [vmem:[%s2293_s0 + $0x280] sm:$0xff]  ;;  %v964_v41 = vld [vmem:[%s2293_s0 + $0x2f8] sm:$0xff] }
 0x1d2   :  { %v1591_v18 = vpack.c.bf16 %v950_v16, %v949_v15  ;;  %v1612_v42 = vpack.c.bf16 %v964_v41, %v963_v40  ;;  %v987_v16 = vld [vmem:[%s2293_s0 + $0x3a0] sm:$0xff]  ;;  %v765_v41 = vld [vmem:[%s2296_s2 + $0x18] sm:$0xff] }
 0x1d3   :  { %207 = vst [vmem:[#allocation2 + $0x2] sm:$0x1] %v206_v43  ;;  %1258 = vmatmul.mubr.f32.vlgmr.msra.gmra.mrb[2].mxu0 %v206_v43 }
 0x1d4   :  { %1327 = vmatprep.mubr.msk.f32.mxu0 %vm1698_vm0, %v1699_v4  ;;  %1568 = vmatpush3.bf16.msra.mxu0 %v1567_v50  ;;  %v971_v50 = vld [vmem:[%s2293_s0 + $0x328] sm:$0xff] }
 0x1d5   :  { %1569 = vmatprep.subr.bf16.mxu0 %v1697_v0  ;;  %v1621_v51 = vpack.c.bf16 %v971_v50, %v970_v49  ;;  %v770_v49 = vld [vmem:[%s2296_s2 + $0x40] sm:$0xff]  ;;  %v771_v50 = vld [vmem:[%s2296_s2 + $0x48] sm:$0xff] }
 0x1d8   :  { %1571 = vmatpush3.bf16.msra.mxu0 %v1570_v52  ;;  %v972_v52 = vld [vmem:[%s2293_s0 + $0x330] sm:$0xff] }
 0x1d9   :  { %1572 = vmatprep.subr.bf16.mxu0 %v1697_v0  ;;  %v1624_v54 = vpack.c.bf16 %v973_v53, %v972_v52  ;;  %v982_v52 = vld [vmem:[%s2295_s1 + $0x6] sm:$0x1] }
 0x1dc   :  { %1574 = vmatpush3.bf16.msra.mxu0 %v1573_v55  ;;  %v974_v55 = vld [vmem:[%s2293_s0 + $0x340] sm:$0xff] }
 0x1dd   :  { %1575 = vmatprep.subr.bf16.mxu0 %v1697_v0  ;;  %v1627_v57 = vpack.c.bf16 %v975_v56, %v974_v55 }
 0x1e0   :  { %1577 = vmatpush3.bf16.msra.mxu0 %v1576_v58  ;;  %v976_v58 = vld [vmem:[%s2293_s0 + $0x350] sm:$0xff] }
 0x1e1   :  { %1578 = vmatprep.subr.bf16.mxu0 %v1697_v0  ;;  %v1630_v60 = vpack.c.bf16 %v977_v59, %v976_v58  ;;  %v772_v58 = vld [vmem:[%s2296_s2 + $0x50] sm:$0xff]  ;;  %v773_v59 = vld [vmem:[%s2296_s2 + $0x58] sm:$0xff] }
 0x1e4   :  { %1580 = vmatpush3.bf16.msra.mxu0 %v1579_v61  ;;  %v978_v61 = vld [vmem:[%s2293_s0 + $0x360] sm:$0xff] }
 0x1e5   :  { %1581 = vmatprep.subr.bf16.mxu0 %v1697_v0  ;;  %v1633_v63 = vpack.c.bf16 %v979_v62, %v978_v61  ;;  %v774_v61 = vld [vmem:[%s2296_s2 + $0x60] sm:$0xff]  ;;  %v775_v62 = vld [vmem:[%s2296_s2 + $0x68] sm:$0xff] }
 0x1e8   :  { %1583 = vmatpush3.bf16.msra.mxu0 %v1582_v1  ;;  %v948_v1 = vld [vmem:[%s2295_s1 + $0x4] sm:$0x1] }
 0x1e9   :  { %1584 = vmatprep.subr.bf16.mxu0 %v1697_v0 }
 0x1ec   :  { %1586 = vmatpush3.bf16.msra.mxu0 %v1585_v5 }
 0x1ed   :  { %1587 = vmatprep.subr.bf16.mxu0 %v1697_v0 }
 0x1f0   :  { %1589 = vmatpush3.bf16.msra.mxu0 %v1588_v14  ;;  %v986_v14 = vld [vmem:[%s2293_s0 + $0x398] sm:$0xff] }
 0x1f1   :  { %1614 = vmatprep.subr.bf16.mxu0 %v1697_v0 }
 0x2a6   :  { %v291_v7 = vpop.f32.mrb[2].mxu0 }
 0x2a7   :  { %v297_v8 = vsub.f32 %v291_v7, %v914_v6  ;;  %v1259_v9 = vpop.f32.mrb[3].mxu0  ;;  %v980_v7 = vld [vmem:[%s2293_s0 + $0x370] sm:$0xff] }
 0x2a9   :  { %v298_v11 = vsub.f32 %v206_v43, %v297_v8  ;;  %v966_v43 = vld [vmem:[%s2293_s0 + $0x300] sm:$0xff]  ;;  %v981_v8 = vld [vmem:[%s2293_s0 + $0x378] sm:$0xff] }
 0x2aa   :  { %v1615_v46 = vpack.c.bf16 %v967_v44, %v966_v43  ;;  %v1636_v9 = vpack.c.bf16 %v981_v8, %v980_v7  ;;  %v766_v43 = vld [vmem:[%s2296_s2 + $0x20] sm:$0xff]  ;;  %v767_v44 = vld [vmem:[%s2296_s2 + $0x28] sm:$0xff] }
 0x2ab   :  { %299 = vst [vmem:[#allocation2 + $0x3] sm:$0x1] %v298_v11  ;;  %1293 = vmatmul.mubr.f32.vlgmr.msra.gmra.mrb[2].mxu1 %v298_v11  ;;  %v1670_v45 = vpack.c.bf16 %v767_v44, %v766_v43 }
 0x2ac   :  { %1362 = vmatprep.mubr.msk.f32.mxu1 %vm1698_vm0, %v1699_v4  ;;  %1592 = vmatpush3.bf16.msra.mxu1 %v1591_v18  ;;  %v1645_v18 = vpack.c.bf16 %v988_v17, %v987_v16 }
 0x2ad   :  { %1593 = vmatprep.subr.bf16.mxu1 %v1697_v0 }
 0x2b0   :  { %1595 = vmatpush3.bf16.msra.mxu1 %v1594_v19  ;;  %v990_v19 = vld [vmem:[%s2293_s0 + $0x3b8] sm:$0xff] }
 0x2b1   :  { %1596 = vmatprep.subr.bf16.mxu1 %v1697_v0  ;;  %v1648_v20 = vpack.c.bf16 %v990_v19, %v989_v10 }
 0x2b4   :  { %1598 = vmatpush3.bf16.msra.mxu1 %v1597_v22  ;;  %v992_v22 = vld [vmem:[%s2293_s0 + $0x3c8] sm:$0xff] }
 0x2b5   :  { %1599 = vmatprep.subr.bf16.mxu1 %v1697_v0  ;;  %v1651_v23 = vpack.c.bf16 %v992_v22, %v991_v21 }
 0x2b8   :  { %1601 = vmatpush3.bf16.msra.mxu1 %v1600_v25  ;;  %v994_v25 = vld [vmem:[%s2293_s0 + $0x3d8] sm:$0xff] }
 0x2b9   :  { %1602 = vmatprep.subr.bf16.mxu1 %v1697_v0  ;;  %v1654_v26 = vpack.c.bf16 %v994_v25, %v993_v24 }
 0x2bc   :  { %1604 = vmatpush3.bf16.msra.mxu1 %v1603_v28  ;;  %v996_v28 = vld [vmem:[%s2293_s0 + $0x3e8] sm:$0xff] }
 0x2bd   :  { %1605 = vmatprep.subr.bf16.mxu1 %v1697_v0  ;;  %v1657_v29 = vpack.c.bf16 %v996_v28, %v995_v27 }
 0x2c0   :  { %1607 = vmatpush3.bf16.msra.mxu1 %v1606_v31 }
 0x2c1   :  { %1608 = vmatprep.subr.bf16.mxu1 %v1697_v0 }
 0x2c4   :  { %1610 = vmatpush3.bf16.msra.mxu1 %v1609_v34 }
 0x2c5   :  { %1611 = vmatprep.subr.bf16.mxu1 %v1697_v0 }
 0x2c8   :  { %1613 = vmatpush3.bf16.msra.mxu1 %v1612_v42 }
 0x2c9   :  { %1638 = vmatprep.subr.bf16.mxu1 %v1697_v0 }
 0x37e   :  { %v383_v36 = vpop.f32.mrb[2].mxu1 }
 0x37f   :  { %v389_v37 = vsub.f32 %v383_v36, %v931_v35  ;;  %v1294_v38 = vpop.f32.mrb[3].mxu1  ;;  %v997_v35 = vld [vmem:[%s2293_s0 + $0x3f0] sm:$0xff]  ;;  %v998_v36 = vld [vmem:[%s2293_s0 + $0x3f8] sm:$0xff] }
 0x380   :  { %v763_v38 = vld [vmem:[%s2296_s2 + $0x8] sm:$0xff] }
 0x381   :  { %v390_v39 = vsub.f32 %v298_v11, %v389_v37  ;;  %v983_v11 = vld [vmem:[%s2293_s0 + $0x380] sm:$0xff]  ;;  %v1660_v37 = vpack.c.bf16 %v998_v36, %v997_v35 }
 0x382   :  { %v1639_v13 = vpack.c.bf16 %v984_v12, %v983_v11  ;;  %v1000_v12 = vld [vmem:[%s2298_s3] ss:$0 sm:$0xff] }
 0x383   :  { %391 = vst [vmem:[#allocation2 + $0x4] sm:$0x1] %v390_v39  ;;  %1328 = vmatmul.mubr.f32.vlgmr.msra.gmra.mrb[4].mxu0 %v390_v39 }
 0x384   :  { %1397 = vmatprep.mubr.msk.f32.mxu0 %vm1698_vm0, %v1699_v4  ;;  %1616 = vmatpush3.bf16.msra.mxu0 %v1615_v46  ;;  %v768_v46 = vld [vmem:[%s2296_s2 + $0x30] sm:$0xff] }
 0x385   :  { %1617 = vmatprep.subr.bf16.mxu0 %v1697_v0 }
 0x388   :  { %1619 = vmatpush3.bf16.msra.mxu0 %v1618_v48  ;;  %v1674_v48 = vpack.c.bf16 %v769_v47, %v768_v46 }
 0x389   :  { %1620 = vmatprep.subr.bf16.mxu0 %v1697_v0 }
 0x38c   :  { %1622 = vmatpush3.bf16.msra.mxu0 %v1621_v51  ;;  %v1678_v51 = vpack.c.bf16 %v771_v50, %v770_v49 }
 0x38d   :  { %1623 = vmatprep.subr.bf16.mxu0 %v1697_v0 }
 0x390   :  { %1625 = vmatpush3.bf16.msra.mxu0 %v1624_v54 }
 0x391   :  { %1626 = vmatprep.subr.bf16.mxu0 %v1697_v0 }
 0x394   :  { %1628 = vmatpush3.bf16.msra.mxu0 %v1627_v57 }
 0x395   :  { %1629 = vmatprep.subr.bf16.mxu0 %v1697_v0 }
 0x398   :  { %1631 = vmatpush3.bf16.msra.mxu0 %v1630_v60  ;;  %v1682_v60 = vpack.c.bf16 %v773_v59, %v772_v58 }
 0x399   :  { %1632 = vmatprep.subr.bf16.mxu0 %v1697_v0 }
 0x39c   :  { %1634 = vmatpush3.bf16.msra.mxu0 %v1633_v63  ;;  %v1686_v63 = vpack.c.bf16 %v775_v62, %v774_v61 }
 0x39d   :  { %1635 = vmatprep.subr.bf16.mxu0 %v1697_v0 }
 0x3a0   :  { %1637 = vmatpush3.bf16.msra.mxu0 %v1636_v9 }
 0x456   :  { %v475_v2 = vpop.f32.mrb[4].mxu0 }
 0x457   :  { %v481_v3 = vsub.f32 %v475_v2, %v948_v1  ;;  %v1329_v5 = vpop.f32.mrb[5].mxu0  ;;  %v776_v1 = vld [vmem:[%s2296_s2 + $0x70] sm:$0xff]  ;;  %v777_v2 = vld [vmem:[%s2296_s2 + $0x78] sm:$0xff] }
 0x458   :  { %v999_v5 = vld [vmem:[%s2295_s1 + $0x7] sm:$0x1] }
 0x459   :  { %v482_v6 = vsub.f32 %v390_v39, %v481_v3  ;;  %v764_v39 = vld [vmem:[%s2296_s2 + $0x10] sm:$0xff]  ;;  %v1690_v3 = vpack.c.bf16 %v777_v2, %v776_v1 }
 0x45a   :  { %v1666_v42 = vpack.c.bf16 %v765_v41, %v764_v39 }
 0x45b   :  { %483 = vst [vmem:[#allocation2 + $0x5] sm:$0x1] %v482_v6  ;;  %1363 = vmatmul.mubr.f32.vlgmr.msra.gmra.mrb[4].mxu1 %v482_v6 }
 0x45c   :  { %1432 = vmatprep.mubr.msk.f32.mxu1 %vm1698_vm0, %v1699_v4  ;;  %v985_v4 = vld [vmem:[%s2293_s0 + $0x390] sm:$0xff]  ;;  %1640 = vmatpush3.bf16.msra.mxu1 %v1639_v13 }
 0x45d   :  { %v1642_v15 = vpack.c.bf16 %v986_v14, %v985_v4  ;;  %1641 = vmatprep.subr.bf16.mxu1 %v1697_v0 }
 0x460   :  { %1643 = vmatpush3.bf16.msra.mxu1 %v1642_v15 }
 0x461   :  { %1644 = vmatprep.subr.bf16.mxu1 %v1697_v0 }
 0x464   :  { %1646 = vmatpush3.bf16.msra.mxu1 %v1645_v18 }
 0x465   :  { %1647 = vmatprep.subr.bf16.mxu1 %v1697_v0 }
 0x468   :  { %1649 = vmatpush3.bf16.msra.mxu1 %v1648_v20 }
 0x469   :  { %1650 = vmatprep.subr.bf16.mxu1 %v1697_v0 }
 0x46c   :  { %1652 = vmatpush3.bf16.msra.mxu1 %v1651_v23 }
 0x46d   :  { %1653 = vmatprep.subr.bf16.mxu1 %v1697_v0 }
 0x470   :  { %1655 = vmatpush3.bf16.msra.mxu1 %v1654_v26 }
 0x471   :  { %1656 = vmatprep.subr.bf16.mxu1 %v1697_v0 }
 0x474   :  { %1658 = vmatpush3.bf16.msra.mxu1 %v1657_v29 }
 0x475   :  { %1659 = vmatprep.subr.bf16.mxu1 %v1697_v0  ;;  %v762_v0 = vld [vmem:[%s2296_s2] sm:$0xff] }
 0x476   :  { %v1662_v40 = vpack.c.bf16 %v763_v38, %v762_v0 }
 0x478   :  { %1661 = vmatpush3.bf16.msra.mxu1 %v1660_v37  ;;  %1663 = vmatprep.subr.bf16.mxu0 %v1662_v40 }
 0x52e   :  { %v567_v31 = vpop.f32.mrb[4].mxu1 }
 0x52f   :  { %v573_v32 = vsub.f32 %v567_v31, %v965_v30  ;;  %v1364_v33 = vpop.f32.mrb[5].mxu1 }
 0x531   :  { %v574_v34 = vsub.f32 %v482_v6, %v573_v32 }
 0x533   :  { %575 = vst [vmem:[#allocation2 + $0x6] sm:$0x1] %v574_v34  ;;  %1398 = vmatmul.mubr.f32.vlgmr.msra.gmra.mrb[6].mxu0 %v574_v34 }
 0x534   :  { %1665 = vmatpush3.bf16.msra.mxu0 %v1662_v40 }
 0x535   :  { %1667 = vmatprep.subr.bf16.mxu0 %v1666_v42 }
 0x538   :  { %1669 = vmatpush3.bf16.msra.mxu0 %v1666_v42 }
 0x539   :  { %1671 = vmatprep.subr.bf16.mxu0 %v1670_v45 }
 0x53c   :  { %1673 = vmatpush3.bf16.msra.mxu0 %v1670_v45 }
 0x53d   :  { %1675 = vmatprep.subr.bf16.mxu0 %v1674_v48 }
 0x540   :  { %1677 = vmatpush3.bf16.msra.mxu0 %v1674_v48 }
 0x541   :  { %1679 = vmatprep.subr.bf16.mxu0 %v1678_v51 }
 0x544   :  { %1681 = vmatpush3.bf16.msra.mxu0 %v1678_v51 }
 0x545   :  { %1683 = vmatprep.subr.bf16.mxu0 %v1682_v60 }
 0x548   :  { %1685 = vmatpush3.bf16.msra.mxu0 %v1682_v60 }
 0x549   :  { %1687 = vmatprep.subr.bf16.mxu0 %v1686_v63 }
 0x54c   :  { %1689 = vmatpush3.bf16.msra.mxu0 %v1686_v63 }
 0x54d   :  { %1691 = vmatprep.subr.bf16.mxu0 %v1690_v3 }
 0x550   :  { %1693 = vmatpush3.bf16.msra.mxu0 %v1690_v3 }
 0x606   :  { %v659_v53 = vpop.f32.mrb[6].mxu0 }
 0x607   :  { %v665_v54 = vsub.f32 %v659_v53, %v982_v52  ;;  %v1399_v55 = vpop.f32.mrb[7].mxu0 }
 0x609   :  { %v666_v56 = vsub.f32 %v574_v34, %v665_v54 }
 0x60b   :  { %667 = vst [vmem:[#allocation2 + $0x7] sm:$0x1] %v666_v56  ;;  %1433 = vmatmul.mubr.f32.vlgmr.msra.gmra.mrb[6].mxu1 %v666_v56 }
 0x612   :  { %v760_v57 = vld [vmem:[#allocation2] sm:$0xff] }
 0x613   :  { %1467 = vmatprep.mubr.f32.mxu0 %v760_v57 }
 0x6de   :  { %v751_v6 = vpop.f32.mrb[6].mxu1 }
 0x6df   :  { %v757_v7 = vsub.f32 %v751_v6, %v999_v5  ;;  %v1434_v8 = vpop.f32.mrb[7].mxu1 }
 0x6e1   :  { %v758_v9 = vsub.f32 %v666_v56, %v757_v7 }
 0x6e3   :  { %759 = vst [vmem:[#allocation2 + $0x8] sm:$0x1] %v758_v9  ;;  %872 = vst [vmem:[%s2297_s6] sm:$0x1] %v758_v9 }
 0x6ea   :  { %v761_v11 = vld [vmem:[#allocation2 + $0x8] sm:$0xff] }
 0x6eb   :  { %1468 = vmatmul.mubr.f32.vlgmr.msra.gmra.mrb[8].mxu0 %v761_v11 }
 0x7be   :  { %v1469_v4 = vpop.f32.mrb[8].mxu0 }
 0x7bf   :  { %v844_v13 = vpop.f32.mrb[9].mxu0  ;;  %v861_v15 = vsub.f32 %v1469_v4, %v1000_v12 }
 0x7c0   :  { %v860_v14 = vsub.f32 %v844_v13, %v1000_v12 }
 0x7c1   :  { %v863_v17 = vmul.f32 %v861_v15, %v861_v15 }
 0x7c2   :  { %v862_v16 = vmul.f32 %v860_v14, %v860_v14 }
 0x7c4   :  { %864 = vadd.xlane.f32.xlu0 %v862_v16 }
 0x7c8   :  { %866 = vadd.xlane.f32.xlu0 %v863_v17 }
 0x851   :  { %v865_v18 = vpop.xlane.xlu0 %864 }
 0x852   :  { %v868_v10 = vmul.f32 0.015625, %v865_v18 }
 0x854   :  { %870 = vst [vmem:[%s2299_s5] sm:$0xff] %v868_v10 }
 0x855   :  { %v867_v19 = vpop.xlane.xlu0 %866 }
 0x856   :  { %v869_v20 = vmul.f32 0.015625, %v867_v19 }
 0x858   :  { %871 = vst [vmem:[%s2299_s5 + $0x8] sm:$0xff] %v869_v20 }

</bundles_post_ra>
